<compile_context>
chip_gen: v7x
topology: tpu7x:2x2x1
jax: 0.10.0
libtpu: 0.0.40
codegen_flags: <defaults>
</compile_context>

<pallas_src>
import math
import functools

import jax
import jax.numpy as jnp
import numpy as np
from jax import lax
from jax.experimental import pallas as pl
from jax.experimental.pallas import tpu as pltpu


def _shift_left_lanes(v, q):
    """out[:, i] = v[:, i + q]; the last q lanes are zero-filled.

    The zero/garbage tail only ever lands in per-batch pad lanes, which are
    killed by the zero-padded classifier weight before they reach the output.
    """
    if q == 0:
        return v
    tail = jnp.zeros((v.shape[0], q), v.dtype)
    return jnp.concatenate([v[:, q:], tail], axis=1)


def _cnn_classifier_kernel(x_ref, w_ref, convb_ref, wcls_ref, out_ref, *,
                           pool_way, q_taps, tb, l_slab, c2, o_eff):
    # x_ref:    (C2, TB*L_slab)   phase-folded input slab (compute dtype)
    # w_ref:    (Q, O_eff, C2)    folded conv weight taps (compute dtype)
    # convb_ref:(O_eff, 1)        conv bias (f32; channel-mean for avg pool)
    # wcls_ref: (1, TB*L_slab)    cls weight tiled per batch segment, zeros in pad lanes
    # out_ref:  (1, 8, TB)        per-batch logits (broadcast over 8 sublanes)
    tn = tb * l_slab
    x = x_ref[...]

    acc = jnp.zeros((o_eff, tn), jnp.float32)
    # Unit-stride conv == Q shifted rank-C2 matmuls accumulated in f32 (MXU has
    # huge slack here; the kernel is DMA-bound).  Shift whichever operand is
    # smaller: the slab (C2 rows) or the matmul result (O_eff rows).
    if o_eff <= c2:
        for q in range(q_taps):
            y = jnp.dot(w_ref[q], x, preferred_element_type=jnp.float32)
            acc = acc + _shift_left_lanes(y, q)
    else:
        for q in range(q_taps):
            xq = _shift_left_lanes(x, q)
            acc = acc + jnp.dot(w_ref[q], xq, preferred_element_type=jnp.float32)

    acc = acc + convb_ref[...]                       # conv bias before the pool

    # permute(0,2,1) + {Max,Avg}Pool1d(kernel=out_ch) == reduction over channels.
    if pool_way == 'avg':
        pooled = acc if o_eff == 1 else jnp.mean(acc, axis=0, keepdims=True)
    else:
        pooled = jnp.max(acc, axis=0, keepdims=True)  # (1, tn)

    # cls Linear(L_out -> 1): VPU multiply by the zero-padded cls weight
    # (kills pad/garbage lanes) + per-batch lane-segment sum.
    weighted = pooled * wcls_ref[...]
    logits = jnp.sum(weighted.reshape(tb, l_slab), axis=1)          # (tb,)
    out_ref[...] = jnp.broadcast_to(logits.reshape(1, 1, tb), (1, 8, tb))


def _choose_batch_tile(batch, c2, o_eff, l_slab, dtype_bytes):
    # Per-lane VMEM estimate: double-buffered slab + f32 accumulator + one shifted
    # temp + epilogue.  A ~16 MiB/step working set keeps every generation happy
    # (v7x 64 MiB physical, v5e/v6e 128 MiB) while making the per-step DMA large
    # enough to hide the ~0.35us fixed grid-step overhead.
    per_lane = (2 * c2 * dtype_bytes + o_eff * 4
                + max(c2 * dtype_bytes, o_eff * 4) + 8)
    budget = 16 * 1024 * 1024
    tb = max(1, budget // (per_lane * l_slab))
    tb = int(min(tb, batch))
    b_pad = ((batch + tb - 1) // tb) * tb
    return tb, b_pad


def cnn_classifier_forward(x, params, *, stride=1, padding=0, pool_way='max',
                           target=None, compute_dtype=jnp.float32):
    """x: (B, vec_num_per_word, in_dim) -> logits (B,)  [optionally (logits, loss)]."""
    conv_w = params['conv_w'].astype(jnp.float32)   # (O, C, K)
    conv_b = params['conv_b'].astype(jnp.float32)   # (O,)
    cls_w = params['cls_w'].astype(jnp.float32)     # (1, L_out)
    cls_b = params['cls_b'].astype(jnp.float32)     # (1,)

    batch, c_in, in_dim = x.shape
    out_ch, _, ksize = conv_w.shape
    s = int(stride)
    l_out = (in_dim + 2 * padding - ksize) // s + 1
    assert cls_w.shape[-1] == l_out

    # ---- phase-fold the strided conv into a unit-stride conv (cheap, no im2col) ----
    #   x2[c*s+p, b, j] = x_pad[b, c, s*j + p]
    #   w2[q, o, c*s+p] = conv_w[o, c, s*q + p]   (zero for s*q+p >= K)
    #   conv(x)[b,o,j]  = sum_{c2,q} w2[q,o,c2] * x2[c2, b, j+q]
    q_taps = -(-ksize // s)                # ceil(K / s)
    c2 = c_in * s
    l_p = in_dim + 2 * padding
    l2 = -(-l_p // s)                      # ceil(L_p / s); >= L_out + q_taps - 1
    l_slab = ((l2 + 127) // 128) * 128     # lane-aligned per-batch segment length

    x = x.astype(compute_dtype)
    x_p = jnp.pad(x, ((0, 0), (0, 0), (padding, l2 * s - l_p + padding)))
    x2 = jnp.transpose(x_p.reshape(batch, c_in, l2, s), (1, 3, 0, 2))   # (C, s, B, L2)
    x2 = x2.reshape(c2, batch, l2)

    w_pad = jnp.pad(conv_w, ((0, 0), (0, 0), (0, q_taps * s - ksize)))
    w2 = jnp.transpose(w_pad.reshape(out_ch, c_in, q_taps, s), (2, 0, 1, 3))
    w2 = w2.reshape(q_taps, out_ch, c2)

    if pool_way == 'avg':
        # mean over channels commutes with the conv: pre-reduce weight & bias.
        w2 = jnp.mean(w2, axis=1, keepdims=True)        # (Q, 1, C2)
        convb = jnp.mean(conv_b).reshape(1, 1)
        o_eff = 1
    else:
        convb = conv_b.reshape(out_ch, 1)
        o_eff = out_ch
    w2 = w2.astype(compute_dtype)

    dtype_bytes = jnp.dtype(compute_dtype).itemsize
    tb, b_pad = _choose_batch_tile(batch, c2, o_eff, l_slab, dtype_bytes)
    grid_b = b_pad // tb
    tn = tb * l_slab

    x2 = jnp.pad(x2, ((0, 0), (0, b_pad - batch), (0, l_slab - l2)))
    x2 = x2.reshape(c2, b_pad * l_slab)                 # lane-dense slab

    wcls = jnp.pad(cls_w.reshape(1, l_out), ((0, 0), (0, l_slab - l_out)))
    wcls = jnp.tile(wcls, (1, tb))                      # (1, tn); zeros kill pad lanes

    kernel = functools.partial(
        _cnn_classifier_kernel, pool_way=pool_way, q_taps=q_taps,
        tb=tb, l_slab=l_slab, c2=c2, o_eff=o_eff)

    vmem_need = (2 * c2 * dtype_bytes + o_eff * 4
                 + max(c2 * dtype_bytes, o_eff * 4) + 8) * tn + (1 << 20)
    vmem_limit = int(min(max(2 * vmem_need, 24 * 1024 * 1024), 48 * 1024 * 1024))

    out = pl.pallas_call(
        kernel,
        grid=(grid_b,),
        in_specs=[
            pl.BlockSpec((c2, tn), lambda i: (0, i)),            # input slab, batch-tiled
            pl.BlockSpec((q_taps, o_eff, c2), lambda i: (0, 0, 0)),  # folded conv weight
            pl.BlockSpec((o_eff, 1), lambda i: (0, 0)),          # conv bias
            pl.BlockSpec((1, tn), lambda i: (0, 0)),             # cls weight (per segment)
        ],
        out_specs=pl.BlockSpec((1, 8, tb), lambda i: (i, 0, 0)),  # lane-dense logits
        out_shape=jax.ShapeDtypeStruct((grid_b, 8, tb), jnp.float32),
        compiler_params=pltpu.CompilerParams(
            dimension_semantics=("parallel",),
            vmem_limit_bytes=vmem_limit),
    )(x2, w2, convb, wcls)

    logits = out[:, 0, :].reshape(-1)[:batch] + cls_b[0]

    if target is not None:
        # BCEWithLogitsLoss (mean reduction) — plain-JAX scalar glue, not a hot path.
        t = target.astype(jnp.float32)
        loss = jnp.mean(jnp.maximum(logits, 0.0) - logits * t +
                        jnp.log1p(jnp.exp(-jnp.abs(logits))))
        return logits, loss
    return logits


def init_params(key, in_dim, out_dim, cnn_kernel_size, vec_num_per_word,
                stride=1, padding=0):
    """Deterministic PyTorch-style uniform init for Conv1d + Linear."""
    l_out = math.floor((in_dim + 2 * padding - (cnn_kernel_size - 1) - 1) / stride + 1)
    k1, k2, k3, k4 = jax.random.split(key, 4)
    fan_conv = vec_num_per_word * cnn_kernel_size
    bc = 1.0 / math.sqrt(fan_conv)
    conv_w = jax.random.uniform(k1, (out_dim, vec_num_per_word, cnn_kernel_size),
                                jnp.float32, -bc, bc)
    conv_b = jax.random.uniform(k2, (out_dim,), jnp.float32, -bc, bc)
    bl = 1.0 / math.sqrt(l_out)
    cls_w = jax.random.uniform(k3, (1, l_out), jnp.float32, -bl, bl)
    cls_b = jax.random.uniform(k4, (1,), jnp.float32, -bl, bl)
    return dict(conv_w=conv_w, conv_b=conv_b, cls_w=cls_w, cls_b=cls_b)


def _reference_forward(x, params, *, stride=1, padding=0, pool_way='max'):
    """Independent plain-JAX reference (lax conv) for the correctness check."""
    h1 = lax.conv_general_dilated(
        x.astype(jnp.float32), params['conv_w'].astype(jnp.float32),
        window_strides=(stride,), padding=[(padding, padding)],
        dimension_numbers=('NCW', 'OIW', 'NCW'),
        precision=lax.Precision.HIGHEST)
    h1 = h1 + params['conv_b'].reshape(1, -1, 1)
    pooled = jnp.mean(h1, axis=1) if pool_way == 'avg' else jnp.max(h1, axis=1)
    return jnp.dot(pooled, params['cls_w'].reshape(-1),
                   precision=lax.Precision.HIGHEST) + params['cls_b'][0]


if __name__ == "__main__":
    # Small module hyper-params consistent with the forward pass.
    in_dim = 16             # sequence length L
    out_dim = 8             # conv out channels == pool kernel size
    cnn_kernel_size = 3
    vec_num_per_word = 4    # conv in channels
    batch = 2

    key = jax.random.PRNGKey(0)
    kx, kp, kt = jax.random.split(key, 3)
    x = jax.random.normal(kx, (batch, vec_num_per_word, in_dim), jnp.float32)
    params = init_params(kp, in_dim, out_dim, cnn_kernel_size, vec_num_per_word)

    # max pool, stride=1, padding=0
    logits = jax.block_until_ready(
        cnn_classifier_forward(x, params, stride=1, padding=0, pool_way='max'))
    ref = _reference_forward(x, params, stride=1, padding=0, pool_way='max')
    assert logits.shape == (batch,)
    assert np.allclose(np.asarray(logits), np.asarray(ref), atol=2e-3, rtol=2e-3)

    # avg pool path (uses the channel-pre-reduced weight)
    logits_avg = jax.block_until_ready(
        cnn_classifier_forward(x, params, stride=1, padding=0, pool_way='avg'))
    ref_avg = _reference_forward(x, params, stride=1, padding=0, pool_way='avg')
    assert np.allclose(np.asarray(logits_avg), np.asarray(ref_avg), atol=2e-3, rtol=2e-3)

    # stride / padding variant (phase-folded wrapper-side)
    params2 = init_params(kp, in_dim, out_dim, cnn_kernel_size, vec_num_per_word,
                          stride=2, padding=1)
    logits_sp = jax.block_until_ready(
        cnn_classifier_forward(x, params2, stride=2, padding=1, pool_way='max'))
    ref_sp = _reference_forward(x, params2, stride=2, padding=1, pool_way='max')
    assert np.allclose(np.asarray(logits_sp), np.asarray(ref_sp), atol=2e-3, rtol=2e-3)

    # bf16 slab path (memory-bound win on v6e/v7x); f32 accumulation, loose tolerance.
    logits_bf16 = jax.block_until_ready(
        cnn_classifier_forward(x, params, pool_way='max', compute_dtype=jnp.bfloat16))
    assert np.allclose(np.asarray(logits_bf16), np.asarray(ref), atol=8e-2, rtol=8e-2)

    # loss path (BCEWithLogits) — plain-JAX glue around the same kernel.
    target = (jax.random.uniform(kt, (batch,)) > 0.5).astype(jnp.float32)
    _, loss = cnn_classifier_forward(x, params, pool_way='max', target=target)
    jax.block_until_ready(loss)
    assert np.isfinite(float(loss))

    print("KERNEL_OK")
</pallas_src>

<mosaic_0001>
module attributes {stable_mosaic.version = 11 : i64} {
  func.func @_cnn_classifier_kernel(%arg0: i32, %arg1: memref<4x256xf32, #tpu.memory_space<vmem>>, %arg2: memref<3x8x4xf32, #tpu.memory_space<vmem>>, %arg3: memref<8x1xf32, #tpu.memory_space<vmem>>, %arg4: memref<1x256xf32, #tpu.memory_space<vmem>>, %arg5: memref<1x8x2xf32, #tpu.memory_space<vmem>>) attributes {dimension_semantics = [#tpu.dimension_semantics<parallel>], iteration_bounds = array<i64: 1>, scalar_prefetch = 0 : i64, scratch_operands = 0 : i64, tpu.core_type = #tpu.core_type<tc>, window_params = [{transform_indices = @transform_0, window_bounds = array<i64: 4, 256>}, {pipeline_mode = #tpu.pipeline_mode<synchronous>, transform_indices = @transform_1, window_bounds = array<i64: 3, 8, 4>}, {pipeline_mode = #tpu.pipeline_mode<synchronous>, transform_indices = @transform_2, window_bounds = array<i64: 8, 1>}, {pipeline_mode = #tpu.pipeline_mode<synchronous>, transform_indices = @transform_3, window_bounds = array<i64: 1, 256>}, {transform_indices = @transform_4, window_bounds = array<i64: 1, 8, 2>}]} {
    %c0 = arith.constant 0 : index
    %c0_0 = arith.constant 0 : index
    %0 = vector.load %arg1[%c0, %c0_0] : memref<4x256xf32, #tpu.memory_space<vmem>>, vector<4x256xf32>
    %cst = arith.constant 0.000000e+00 : f32
    %1 = vector.broadcast %cst : f32 to vector<8x256xf32>
    %c0_1 = arith.constant 0 : index
    %c0_2 = arith.constant 0 : index
    %c0_3 = arith.constant 0 : index
    %2 = vector.load %arg2[%c0_1, %c0_2, %c0_3] : memref<3x8x4xf32, #tpu.memory_space<vmem>>, vector<1x8x4xf32>
    %3 = vector.shape_cast %2 : vector<1x8x4xf32> to vector<8x4xf32>
    %cst_4 = arith.constant dense<0.000000e+00> : vector<8x256xf32>
    %4 = tpu.matmul %3, %0, %cst_4 {dimension_numbers = #tpu.dot_dimension_numbers<[1], [0], [0], [1], [0, 0, 1, 1], [], []>} : vector<8x4xf32>, vector<4x256xf32>, vector<8x256xf32> -> vector<8x256xf32>
    %5 = arith.addf %1, %4 : vector<8x256xf32>
    %cst_5 = arith.constant 0.000000e+00 : f32
    %6 = vector.broadcast %cst_5 : f32 to vector<4x1xf32>
    %7 = vector.extract_strided_slice %0 {offsets = [0, 1], sizes = [4, 255], strides = [1, 1]} : vector<4x256xf32> to vector<4x255xf32>
    %8 = tpu.concatenate %7, %6 in 1 : vector<4x255xf32>, vector<4x1xf32> -> vector<4x256xf32>
    %c1 = arith.constant 1 : index
    %c0_6 = arith.constant 0 : index
    %c0_7 = arith.constant 0 : index
    %9 = vector.load %arg2[%c1, %c0_6, %c0_7] : memref<3x8x4xf32, #tpu.memory_space<vmem>>, vector<1x8x4xf32>
    %10 = vector.shape_cast %9 : vector<1x8x4xf32> to vector<8x4xf32>
    %cst_8 = arith.constant dense<0.000000e+00> : vector<8x256xf32>
    %11 = tpu.matmul %10, %8, %cst_8 {dimension_numbers = #tpu.dot_dimension_numbers<[1], [0], [0], [1], [0, 0, 1, 1], [], []>} : vector<8x4xf32>, vector<4x256xf32>, vector<8x256xf32> -> vector<8x256xf32>
    %12 = arith.addf %5, %11 : vector<8x256xf32>
    %cst_9 = arith.constant 0.000000e+00 : f32
    %13 = vector.broadcast %cst_9 : f32 to vector<4x2xf32>
    %14 = vector.extract_strided_slice %0 {offsets = [0, 2], sizes = [4, 254], strides = [1, 1]} : vector<4x256xf32> to vector<4x254xf32>
    %15 = tpu.concatenate %14, %13 in 1 : vector<4x254xf32>, vector<4x2xf32> -> vector<4x256xf32>
    %c2 = arith.constant 2 : index
    %c0_10 = arith.constant 0 : index
    %c0_11 = arith.constant 0 : index
    %16 = vector.load %arg2[%c2, %c0_10, %c0_11] : memref<3x8x4xf32, #tpu.memory_space<vmem>>, vector<1x8x4xf32>
    %17 = vector.shape_cast %16 : vector<1x8x4xf32> to vector<8x4xf32>
    %cst_12 = arith.constant dense<0.000000e+00> : vector<8x256xf32>
    %18 = tpu.matmul %17, %15, %cst_12 {dimension_numbers = #tpu.dot_dimension_numbers<[1], [0], [0], [1], [0, 0, 1, 1], [], []>} : vector<8x4xf32>, vector<4x256xf32>, vector<8x256xf32> -> vector<8x256xf32>
    %19 = arith.addf %12, %18 : vector<8x256xf32>
    %c0_13 = arith.constant 0 : index
    %c0_14 = arith.constant 0 : index
    %20 = vector.load %arg3[%c0_13, %c0_14] : memref<8x1xf32, #tpu.memory_space<vmem>>, vector<8x1xf32>
    %21 = vector.broadcast %20 : vector<8x1xf32> to vector<8x256xf32>
    %22 = arith.addf %19, %21 : vector<8x256xf32>
    %cst_15 = arith.constant dense<0xFF800000> : vector<256xf32>
    %23 = vector.multi_reduction <maximumf>, %22, %cst_15 [0] : vector<8x256xf32> to vector<256xf32>
    %24 = vector.shape_cast %23 : vector<256xf32> to vector<1x256xf32>
    %c0_16 = arith.constant 0 : index
    %c0_17 = arith.constant 0 : index
    %25 = vector.load %arg4[%c0_16, %c0_17] : memref<1x256xf32, #tpu.memory_space<vmem>>, vector<1x256xf32>
    %26 = arith.mulf %24, %25 : vector<1x256xf32>
    %27 = vector.shape_cast %26 : vector<1x256xf32> to vector<2x128xf32>
    %cst_18 = arith.constant dense<0.000000e+00> : vector<2xf32>
    %28 = vector.multi_reduction <add>, %27, %cst_18 [1] : vector<2x128xf32> to vector<2xf32>
    %29 = vector.shape_cast %28 : vector<2xf32> to vector<1x1x2xf32>
    %30 = vector.shape_cast %29 : vector<1x1x2xf32> to vector<1x1x2xf32>
    %31 = vector.broadcast %30 : vector<1x1x2xf32> to vector<1x8x2xf32>
    %c0_19 = arith.constant 0 : index
    %c0_20 = arith.constant 0 : index
    %c0_21 = arith.constant 0 : index
    %32 = vector.load %arg5[%c0_19, %c0_20, %c0_21] : memref<1x8x2xf32, #tpu.memory_space<vmem>>, vector<1x8x2xf32>
    tpu.vector_store %arg5[%c0_19, %c0_20, %c0_21], %31 {strides = array<i32>} : memref<1x8x2xf32, #tpu.memory_space<vmem>>, vector<1x8x2xf32>,
    return
  }
  func.func @transform_0(%arg0: i32) -> (i32, i32) {
    %c0_i32 = arith.constant 0 : i32
    %c0_i32_0 = arith.constant 0 : i32
    return %c0_i32, %arg0 : i32, i32
  }
  func.func @transform_1(%arg0: i32) -> (i32, i32, i32) {
    %c0_i32 = arith.constant 0 : i32
    %c0_i32_0 = arith.constant 0 : i32
    %c0_i32_1 = arith.constant 0 : i32
    %c0_i32_2 = arith.constant 0 : i32
    return %c0_i32, %c0_i32_0, %c0_i32_1 : i32, i32, i32
  }
  func.func @transform_2(%arg0: i32) -> (i32, i32) {
    %c0_i32 = arith.constant 0 : i32
    %c0_i32_0 = arith.constant 0 : i32
    %c0_i32_1 = arith.constant 0 : i32
    return %c0_i32, %c0_i32_0 : i32, i32
  }
  func.func @transform_3(%arg0: i32) -> (i32, i32) {
    %c0_i32 = arith.constant 0 : i32
    %c0_i32_0 = arith.constant 0 : i32
    %c0_i32_1 = arith.constant 0 : i32
    return %c0_i32, %c0_i32_0 : i32, i32
  }
  func.func @transform_4(%arg0: i32) -> (i32, i32, i32) {
    %c0_i32 = arith.constant 0 : i32
    %c0_i32_0 = arith.constant 0 : i32
    %c0_i32_1 = arith.constant 0 : i32
    return %arg0, %c0_i32, %c0_i32_0 : i32, i32, i32
  }
}

</mosaic_0001>

<bundles_post_ra>
// kernel: tpu_custom_call.1
= control target key start
LH: loop header
LB: loop body
LE: loop exit
PB: predicated region body
PF: predicated region fallthrough
CT: control target
= control target key end

     0   :  { %vm35_vm0 = vcmask 1043456   ;;  %v378_v1 = vmov 0.0   ;;  %s379_s17 = smov 127   ;;  %v380_v3 = vmov 0   ;;  %vm31_vm1 = vcmask 31744   ;;  %s438_s0 = inlined_call_operand.vmem [shape: f32[4,256], index: 0, kind: input, shape index: {}]   ;;  %s439_s1 = inlined_call_operand.vmem [shape: f32[3,8,4], index: 1, kind: input, shape index: {}]   ;;  %s440_s2 = inlined_call_operand.vmem [shape: f32[8,1], index: 2, kind: input, shape index: {}]   ;;  %s441_s3 = inlined_call_operand.vmem [shape: f32[1,256], index: 3, kind: input, shape index: {}]   ;;  %s442_s4 = inlined_call_operand.vmem [shape: f32[1,8,2], index: 4, kind: output, shape index: {}]  }
   0x1   :  { %v17_v0 = vld [vmem:[%s438_s0] sm:$0xff]  ;;  %183 = vmatprep.mubr.f32.mxu0 %v378_v1  ;;  %105 = vmatprep.mubr.f32.mxu1 %v378_v1  ;;  %s381_s0 = smov 126   ;;  %vm25_vm2 = vcmask 1039360   ;;  %v356_v10 = vld [vmem:[%s439_s1 + $0x8] sm:$0xff]  ;;  %vm194_vm3 = vcmask 1031168   ;;  %v363_v15 = vld [vmem:[%s439_s1 + $0x10] sm:$0xff]  ;;  %v303_v16 = vlaneseq }
   0x2   :  { %21 = vrot.lane.b32.xlu1 %v17_v0, %s379_s17  ;;  %v20_v2 = vcombine.high %v17_v0, %v17_v0  ;;  %376 = vset.pattern.permute.xlu0 %v380_v3  ;;  %v18_v4 = vld [vmem:[%s439_s1] sm:$0xff]  ;;  %v382_v38 = vmov 1935823168   ;;  %vm326_vm4 = vcmask 1041408   ;;  %vm350_vm5 = vcmask 15360  }
   0x3   :  { %v281_v5 = vld [vmem:[%s440_s2] sm:$0xff]  ;;  %v304_v17 = vshrl.u32 %v303_v16, 7  ;;  %v332_v18 = vand.u32 127, %v303_v16  ;;  %v320_v39 = vunpack.c.l.s4 %v382_v38 }
   0x4   :  { %23 = vrot.lane.b32.xlu0 %v20_v2, %s379_s17  ;;  %360 = vmatprep.subr.msk.mxu0 %vm35_vm0, %v20_v2  ;;  %v301_v36 = vld [vmem:[%s441_s3] sm:$0x3] }
   0x5   :  { %361 = vmatpush1.msk.msra.mxu0 %vm35_vm0, %v17_v0  ;;  %v335_v19 = vsub.s32 %v332_v18, %v304_v17  ;;  %v305_v34 = vsub.s32 0, %v304_v17  ;;  %v309_v37 = vsub.s32 1, %v304_v17  ;;  %v321_v46 = vunpack.c.0.s8 %v320_v39 }
   0x6   :  { %190 = vrot.lane.b32.xlu1 %v17_v0, %s381_s0  ;;  %362 = vmatmul.mubr.msk.f32.vlgmr.msra.gmra.mrb[0].mxu0 %vm31_vm1, %v18_v4 }
   0x7   :  { %272 = vmatprep.mubr.f32.mxu0 %v378_v1  ;;  %v306_v43 = vrot.slane %v301_v36, %v305_v34  ;;  %v310_v45 = vrot.slane %v301_v36, %v309_v37  ;;  %v324_v51 = vsub.s32 %v321_v46, %v304_v17 }
   0x8   :  { %192 = vrot.lane.b32.xlu0 %v20_v2, %s381_s0 }
   0xc   :  { %284 = vperm.xlu0 %376, %v281_v5  }
  0x74   :  { %v22_v6 = vpop.permute.xlu1 %21 }
  0x76   :  { %v24_v7 = vpop.permute.xlu0 %23 }
  0x77   :  { %v28_v8 = vsel %vm25_vm2, %v24_v7, 0.0  ;;  %v26_v9 = vsel %vm25_vm2, %v22_v6, %v24_v7 }
  0x78   :  { %357 = vmatprep.subr.msk.mxu1 %vm35_vm0, %v28_v8  ;;  %v191_v11 = vpop.permute.xlu1 %190 }
  0x79   :  { %358 = vmatpush1.msk.msra.mxu1 %vm35_vm0, %v26_v9 }
  0x7a   :  { %v193_v12 = vpop.permute.xlu0 %192  ;;  %359 = vmatmul.mubr.msk.f32.vlgmr.msra.gmra.mrb[0].mxu1 %vm31_vm1, %v356_v10 }
  0x7b   :  { %v195_v13 = vsel %vm194_vm3, %v191_v11, %v193_v12  ;;  %v197_v14 = vsel %vm194_vm3, %v193_v12, 0.0 }
  0x7c   :  { %364 = vmatprep.subr.msk.mxu0 %vm35_vm0, %v197_v14 }
  0x7d   :  { %365 = vmatpush1.msk.msra.mxu0 %vm35_vm0, %v195_v13 }
  0x7e   :  { %366 = vmatmul.mubr.msk.f32.vlgmr.msra.gmra.mrb[0].mxu0 %vm31_vm1, %v363_v15 }
  0x8b   :  { %v285_v23 = vpop.permute.xlu0 %284 }
 0x14d   :  { %v107_v20 = vpop.f32.mrb[0].mxu1 }
 0x14e   :  { %v109_v21 = vpop.f32.mrb[1].mxu1 }
 0x151   :  { %v274_v22 = vpop.f32.mrb[0].mxu0 }
 0x152   :  { %v367_v24 = vadd.f32 %v274_v22, %v107_v20  ;;  %v276_v25 = vpop.f32.mrb[1].mxu0 }
 0x153   :  { %v368_v26 = vadd.f32 %v276_v25, %v109_v21 }
 0x154   :  { %v287_v27 = vadd.f32 %v367_v24, %v285_v23 }
 0x155   :  { %v288_v28 = vadd.f32 %v368_v26, %v285_v23 }
 0x156   :  { %v289_v29 = vrot.slane %v287_v27, 4 }
 0x157   :  { %v295_v30 = vrot.slane %v288_v28, 4 }
 0x158   :  { %v290_v31 = vmax.f32 %v287_v27, %v289_v29 }
 0x159   :  { %v296_v32 = vmax.f32 %v288_v28, %v295_v30 }
 0x15a   :  { %v291_v33 = vrot.slane %v290_v31, 2 }
 0x15b   :  { %v297_v35 = vrot.slane %v296_v32, 2 }
 0x15c   :  { %v292_v40 = vmax.f32 %v290_v31, %v291_v33 }
 0x15d   :  { %v298_v41 = vmax.f32 %v296_v32, %v297_v35 }
 0x15e   :  { %v293_v42 = vrot.slane %v292_v40, 1 }
 0x15f   :  { %v299_v44 = vrot.slane %v298_v41, 1 }
 0x160   :  { %v294_v47 = vmax.f32 %v292_v40, %v293_v42 }
 0x161   :  { %v300_v48 = vmax.f32 %v298_v41, %v299_v44 }
 0x162   :  { %v313_v49 = vmul.f32 %v306_v43, %v294_v47 }
 0x163   :  { %v314_v50 = vmul.f32 %v310_v45, %v300_v48 }
 0x165   :  { %v317_v52 = vcombine.low %v313_v49, %v314_v50 }
 0x167   :  { %v325_v53 = vrot.slane %v317_v52, %v324_v51 }
 0x169   :  { %v327_v54 = vsel %vm326_vm4, %v325_v53, 0.0 }
 0x16a   :  { %328 = vadd.xlane.f32.xlu1 %v327_v54 }
 0x1f7   :  { %v329_v55 = vpop.xlane.xlu1 %328 }
 0x1f8   :  { %v336_v56 = vrot.slane %v329_v55, %v335_v19 }
 0x1fa   :  { %351 = vst.msk [vmem:[%s442_s4] sm:$0xff] %vm350_vm5, %v336_v56 }

</bundles_post_ra>
